<compile_context>
chip_gen: v7x
topology: tpu7x:2x2x1
jax: 0.10.0
libtpu: 0.0.40
codegen_flags: <defaults>
</compile_context>

<pallas_src>
import functools
import math

import jax
import jax.numpy as jnp
from jax.experimental import pallas as pl
from jax.experimental.pallas import tpu as pltpu


# ----------------------------------------------------------------------------
# Kernel
# ----------------------------------------------------------------------------
def encoder_block_kernel(xcat_ref, t1_ref, t2_ref, sshift_ref,
                         b1_ref, g1_ref, bt1_ref, p1_ref,
                         b2_ref, g2_ref, bt2_ref, p2_ref,
                         he_ref, ho_ref, wsel_ref,
                         pooled_ref, feat_ref, *, cmid):
    """Fused EncoderBlock2d forward on batch-stacked, 128-lane-padded slabs.

    xcat_ref:   (N*H1, 3*W*Cin)  bf16   stage-1 rows, taps K-concatenated
    t1_ref:     (3*W*Cin, 128)   bf16   conv1 block-Toeplitz weights (padded)
    t2_ref:     (3*128, 128)     bf16   conv2 block-Toeplitz weights (padded)
    sshift_ref: (3*N*H2, N*H1)   bf16   row-shift selection (builds conv2 input)
    b*/g*/bt*:  (1, 128)         f32    bias / gamma / beta tiled over w, padded
    p1/p2:      (128, 128)       f32    per-channel stat expansion, 1/cnt folded
    he/ho:      (N*Hp, N*H2)     bf16   even/odd row selectors (maxpool)
    wsel:       (128, 128)       bf16   even-column compaction (maxpool)
    pooled_ref: (N*Hp, 128)      f32    output (post maxpool, lane-padded)
    feat_ref:   (N*H2, 128)      f32    output (pre-pool features, lane-padded)
    """
    f32 = jnp.float32
    eps = 1e-5

    def bn_relu(acc, p_ref, g_ref, bt_ref):
        # Training-mode BatchNorm + ReLU on a batch-stacked (rows, 128) slab.
        # Padded lanes are exactly 0 and their gamma/beta/p-matrix columns are
        # 0, so they stay exactly 0 through BN and ReLU.  Stats are kept in
        # f32; E[X^2]-E[X]^2 is safe here since conv outputs are ~zero-mean.
        lanes = acc.shape[1]
        tot = jnp.sum(acc, axis=0, keepdims=True)                 # (1, 128)
        totsq = jnp.sum(acc * acc, axis=0, keepdims=True)         # (1, 128)
        row = jax.lax.broadcasted_iota(jnp.int32, (2, lanes), 0)
        stacked = jnp.where(row == 0,
                            jnp.broadcast_to(tot, (2, lanes)),
                            jnp.broadcast_to(totsq, (2, lanes)))
        # ONE expansion matmul per stage; 1/count already folded into p.
        stats = jnp.dot(stacked, p_ref[...], preferred_element_type=f32)
        mean = stats[0:1]
        var = jnp.maximum(stats[1:2] - mean * mean, 0.0)
        scale = g_ref[...] * jax.lax.rsqrt(var + eps)
        shift = bt_ref[...] - mean * scale
        return jnp.maximum(acc * scale + shift, 0.0)

    # ---- Stage 1: conv1 = single batch-stacked, K-concatenated MXU push.
    acc1 = jnp.dot(xcat_ref[...], t1_ref[...],
                   preferred_element_type=f32) + b1_ref[...]      # (N*H1, 128)
    y1 = bn_relu(acc1, p1_ref, g1_ref, bt1_ref)                   # (N*H1, 128)

    # ---- Stage 2: build the batch-stacked, K-concatenated conv2 input with
    # one row-shift selection matmul, 8-aligned row slices and 128-aligned
    # lane concats, then a single MXU push.
    nh2 = sshift_ref.shape[0] // 3
    shifted = jnp.dot(sshift_ref[...], y1.astype(jnp.bfloat16),
                      preferred_element_type=f32)                 # (3*N*H2, 128)
    y1cat = jnp.concatenate(
        [shifted[0:nh2], shifted[nh2:2 * nh2], shifted[2 * nh2:3 * nh2]],
        axis=1).astype(jnp.bfloat16)                              # (N*H2, 384)
    acc2 = jnp.dot(y1cat, t2_ref[...],
                   preferred_element_type=f32) + b2_ref[...]      # (N*H2, 128)
    feat = bn_relu(acc2, p2_ref, g2_ref, bt2_ref)                 # (N*H2, 128)
    feat_ref[...] = feat.astype(feat_ref.dtype)   # one unmasked 128-lane store

    # ---- Stage 3: 2x2 stride-2 maxpool.  Row pairs via two block-diagonal
    # selection matmuls on the stacked slab; column pairs via an XLU lane roll
    # (max with the +cmid-shifted copy) and one compaction matmul.
    rows = jnp.maximum(
        jnp.dot(he_ref[...].astype(f32), feat, preferred_element_type=f32),
        jnp.dot(ho_ref[...].astype(f32), feat, preferred_element_type=f32))
    lanes = rows.shape[1]
    colmax = jnp.maximum(rows, pltpu.roll(rows, lanes - cmid, axis=1))
    pooled_ref[...] = jnp.dot(colmax, wsel_ref[...].astype(f32),
                              preferred_element_type=f32).astype(pooled_ref.dtype)


# ----------------------------------------------------------------------------
# Wrapper-side constant builders (weight/selector preprocessing, pure XLA)
# ----------------------------------------------------------------------------
def _row_conv_matrices(w, w_in):
    """Block-Toeplitz matrices T[kh] such that a valid 3x3 conv over the
    (w*cin)-flattened row layout is  out[h] = sum_kh in[h + kh] @ T[kh]."""
    kh_, kw_, cin, cout = w.shape
    w_out = w_in - kw_ + 1
    wi = jnp.arange(w_in)[:, None, None]
    kwi = jnp.arange(kw_)[None, :, None]
    woi = jnp.arange(w_out)[None, None, :]
    mask = (wi == woi + kwi).astype(w.dtype)                 # (w_in, kw, w_out)
    t5 = jnp.einsum('wko,hkic->hwioc', mask, w,
                    precision=jax.lax.Precision.HIGHEST)
    return t5.reshape(kh_, w_in * cin, w_out * cout)


def _tile_pad(v, w_len, ch, pad_to):
    """Tile a per-channel (ch,) vector over w and zero-pad to pad_to lanes."""
    t = jnp.tile(jnp.reshape(v, (1, ch)), (1, w_len)).astype(jnp.float32)
    return jnp.pad(t, ((0, 0), (0, pad_to - w_len * ch)))


def _channel_stat_matrix(w_len, ch, pad_to, inv_cnt):
    """(pad,pad) matrix: sums lanes of the same channel, scales by 1/count,
    and broadcasts back onto every real (w, c) lane; pad rows/cols are 0."""
    idx = jnp.arange(pad_to)
    real = idx < w_len * ch
    same_c = (idx[:, None] % ch) == (idx[None, :] % ch)
    keep = same_c & real[:, None] & real[None, :]
    return jnp.where(keep, jnp.float32(inv_cnt), jnp.float32(0.0))


def _shift_stack_matrix(n, h1, h2, dtype=jnp.bfloat16):
    """(3*N*H2, N*H1) selection: row k*(N*H2)+ni*H2+ho picks y1 row ni*H1+ho+k."""
    r = jnp.arange(3 * n * h2)
    k = r // (n * h2)
    rem = r % (n * h2)
    src = (rem // h2) * h1 + (rem % h2) + k
    c = jnp.arange(n * h1)
    return (c[None, :] == src[:, None]).astype(dtype)


def _pool_row_selectors(n, h_img, hp, dtype=jnp.bfloat16):
    """Block-diagonal even/odd row selectors over the batch-stacked feature slab."""
    r = jnp.arange(n * hp)
    c = jnp.arange(n * h_img)
    even = (r // hp) * h_img + 2 * (r % hp)
    he = (c[None, :] == even[:, None]).astype(dtype)
    ho = (c[None, :] == even[:, None] + 1).astype(dtype)
    return he, ho


def _pool_col_selector(w_in, ch, pad, dtype=jnp.bfloat16):
    """(pad,pad) compaction: dst lane (wp,c) picks src lane (2*wp, c)."""
    wp = w_in // 2
    src = jnp.arange(pad)[:, None]
    dst = jnp.arange(pad)[None, :]
    target = 2 * (dst // ch) * ch + dst % ch
    keep = (src == target) & (dst < wp * ch) & (src < w_in * ch)
    return keep.astype(dtype)


# ----------------------------------------------------------------------------
# Public wrapper (NCHW in / NCHW out)
# ----------------------------------------------------------------------------
@jax.jit
def encoder_block_2d(x_nchw, params):
    n, cin, h, w = x_nchw.shape
    cmid = params["w1"].shape[-1]
    h1, w1 = h - 2, w - 2
    h2, w2 = h1 - 2, w1 - 2
    hp, wp = h2 // 2, w2 // 2
    c1, c2 = w1 * cmid, w2 * cmid
    lane = 128
    c1p = -(-c1 // lane) * lane          # 112 -> 128
    c2p = -(-c2 // lane) * lane          # 96  -> 128

    # Stage-1 input: batch-stacked rows, the 3 kh taps concatenated along K,
    # cast to bf16 (MXU-native).  Pure wrapper-side layout plumbing.
    x_rows = jnp.transpose(x_nchw, (0, 2, 3, 1)).reshape(n, h, w * cin)
    xcat = jnp.concatenate([x_rows[:, kh:kh + h1, :] for kh in range(3)],
                           axis=-1).reshape(n * h1, 3 * w * cin)
    xcat = xcat.astype(jnp.bfloat16)

    # K-concatenated, lane-padded block-Toeplitz conv weights in bf16.
    t1 = _row_conv_matrices(params["w1"], w)                 # (3, W*Cin, c1)
    t1 = jnp.pad(t1, ((0, 0), (0, 0), (0, c1p - c1)))
    t1 = t1.reshape(3 * w * cin, c1p).astype(jnp.bfloat16)
    t2 = _row_conv_matrices(params["w2"], w1)                # (3, c1, c2)
    t2 = jnp.pad(t2, ((0, 0), (0, c1p - c1), (0, c2p - c2)))
    t2 = t2.reshape(3 * c1p, c2p).astype(jnp.bfloat16)

    # Per-lane BN/bias vectors (f32; element-wise math stays f32).
    b1f = _tile_pad(params["b1"], w1, cmid, c1p)
    g1f = _tile_pad(params["gamma"], w1, cmid, c1p)
    bt1f = _tile_pad(params["beta"], w1, cmid, c1p)
    b2f = _tile_pad(params["b2"], w2, cmid, c2p)
    g2f = _tile_pad(params["gamma"], w2, cmid, c2p)
    bt2f = _tile_pad(params["beta"], w2, cmid, c2p)

    # Channel-stat expansion matrices with 1/count folded in (f32, exact-ish).
    p1 = _channel_stat_matrix(w1, cmid, c1p, 1.0 / (n * h1 * w1))
    p2 = _channel_stat_matrix(w2, cmid, c2p, 1.0 / (n * h2 * w2))

    # 0/1 selection matrices stored as bf16 (values exact).
    sshift = _shift_stack_matrix(n, h1, h2)
    he, ho = _pool_row_selectors(n, h2, hp)
    wsel = _pool_col_selector(w2, cmid, c2p)

    vmem = pl.BlockSpec(memory_space=pltpu.MemorySpace.VMEM)
    kernel = functools.partial(encoder_block_kernel, cmid=cmid)
    cost = pl.CostEstimate(flops=5_000_000, transcendentals=256,
                           bytes_accessed=360_000)

    pooled_flat, feat_flat = pl.pallas_call(
        kernel,
        out_shape=(jax.ShapeDtypeStruct((n * hp, c2p), jnp.float32),
                   jax.ShapeDtypeStruct((n * h2, c2p), jnp.float32)),
        in_specs=[vmem] * 15,
        out_specs=(vmem, vmem),
        compiler_params=pltpu.CompilerParams(vmem_limit_bytes=32 * 1024 * 1024),
        cost_estimate=cost,
    )(xcat, t1, t2, sshift, b1f, g1f, bt1f, p1, b2f, g2f, bt2f, p2, he, ho, wsel)

    feat = feat_flat.reshape(n, h2, c2p)[:, :, :c2].reshape(n, h2, w2, cmid)
    feat = jnp.transpose(feat, (0, 3, 1, 2))
    pooled = pooled_flat.reshape(n, hp, c2p)[:, :, :wp * cmid]
    pooled = jnp.transpose(pooled.reshape(n, hp, wp, cmid), (0, 3, 1, 2))
    return pooled, feat


# ----------------------------------------------------------------------------
# Pure-JAX reference (XLA conv / reduce_window, f32) for validation
# ----------------------------------------------------------------------------
def reference_forward(x_nchw, params):
    x = jnp.transpose(x_nchw, (0, 2, 3, 1))
    g = params["gamma"].reshape(1, 1, 1, -1)
    b = params["beta"].reshape(1, 1, 1, -1)

    def conv(v, wgt, bias):
        out = jax.lax.conv_general_dilated(
            v, wgt, window_strides=(1, 1), padding="VALID",
            dimension_numbers=("NHWC", "HWIO", "NHWC"),
            precision=jax.lax.Precision.HIGHEST)
        return out + bias.reshape(1, 1, 1, -1)

    def bn_relu(v):
        m = jnp.mean(v, axis=(0, 1, 2), keepdims=True)
        var = jnp.mean((v - m) ** 2, axis=(0, 1, 2), keepdims=True)
        return jnp.maximum((v - m) * jax.lax.rsqrt(var + 1e-5) * g + b, 0.0)

    y = bn_relu(conv(x, params["w1"], params["b1"]))
    y = bn_relu(conv(y, params["w2"], params["b2"]))
    pooled = jax.lax.reduce_window(y, -jnp.inf, jax.lax.max,
                                   (1, 2, 2, 1), (1, 2, 2, 1), "VALID")
    return (jnp.transpose(pooled, (0, 3, 1, 2)), jnp.transpose(y, (0, 3, 1, 2)))


if __name__ == "__main__":
    N, Cin, Cmid, H, W = 2, 4, 8, 16, 16   # dim1=4, dim2=8

    key = jax.random.PRNGKey(0)
    kx, kw1, kb1, kw2, kb2, kg, kbt = jax.random.split(key, 7)

    x = jax.random.normal(kx, (N, Cin, H, W), jnp.float32)
    params = {
        "w1": jax.random.normal(kw1, (3, 3, Cin, Cmid), jnp.float32)
              * (1.0 / math.sqrt(9 * Cin)),
        "b1": jax.random.normal(kb1, (1, Cmid), jnp.float32) * 0.1,
        "w2": jax.random.normal(kw2, (3, 3, Cmid, Cmid), jnp.float32)
              * (1.0 / math.sqrt(9 * Cmid)),
        "b2": jax.random.normal(kb2, (1, Cmid), jnp.float32) * 0.1,
        "gamma": 1.0 + 0.1 * jax.random.normal(kg, (1, Cmid), jnp.float32),
        "beta": 0.1 * jax.random.normal(kbt, (1, Cmid), jnp.float32),
    }

    pooled, feat = encoder_block_2d(x, params)
    jax.block_until_ready((pooled, feat))

    assert pooled.shape == (N, Cmid, (H - 4) // 2, (W - 4) // 2)
    assert feat.shape == (N, Cmid, H - 4, W - 4)

    ref_pooled, ref_feat = reference_forward(x, params)
    err_p = float(jnp.max(jnp.abs(pooled - ref_pooled)))
    err_f = float(jnp.max(jnp.abs(feat - ref_feat)))
    # Tolerance reflects intentional bf16 MXU operands (review item 1); the
    # all-f32 variant of this kernel matched the reference at 1e-2.
    if not (jnp.allclose(pooled, ref_pooled, atol=4e-2, rtol=4e-2)
            and jnp.allclose(feat, ref_feat, atol=4e-2, rtol=4e-2)):
        raise SystemExit(f"mismatch vs reference: pooled={err_p} feat={err_f}")

    print("KERNEL_OK")
</pallas_src>

<mosaic_0001>
module attributes {stable_mosaic.version = 11 : i64} {
  func.func @encoder_block_kernel(%arg0: memref<28x192xbf16, #tpu.memory_space<vmem>>, %arg1: memref<192x128xbf16, #tpu.memory_space<vmem>>, %arg2: memref<384x128xbf16, #tpu.memory_space<vmem>>, %arg3: memref<72x28xbf16, #tpu.memory_space<vmem>>, %arg4: memref<1x128xf32, #tpu.memory_space<vmem>>, %arg5: memref<1x128xf32, #tpu.memory_space<vmem>>, %arg6: memref<1x128xf32, #tpu.memory_space<vmem>>, %arg7: memref<128x128xf32, #tpu.memory_space<vmem>>, %arg8: memref<1x128xf32, #tpu.memory_space<vmem>>, %arg9: memref<1x128xf32, #tpu.memory_space<vmem>>, %arg10: memref<1x128xf32, #tpu.memory_space<vmem>>, %arg11: memref<128x128xf32, #tpu.memory_space<vmem>>, %arg12: memref<12x24xbf16, #tpu.memory_space<vmem>>, %arg13: memref<12x24xbf16, #tpu.memory_space<vmem>>, %arg14: memref<128x128xbf16, #tpu.memory_space<vmem>>, %arg15: memref<12x128xf32, #tpu.memory_space<vmem>>, %arg16: memref<24x128xf32, #tpu.memory_space<vmem>>) attributes {dimension_semantics = [], scalar_prefetch = 0 : i64, scratch_operands = 0 : i64, tpu.core_type = #tpu.core_type<tc>} {
    %c0 = arith.constant 0 : index
    %c0_0 = arith.constant 0 : index
    %0 = vector.load %arg0[%c0, %c0_0] : memref<28x192xbf16, #tpu.memory_space<vmem>>, vector<28x192xbf16>
    %c0_1 = arith.constant 0 : index
    %c0_2 = arith.constant 0 : index
    %1 = vector.load %arg1[%c0_1, %c0_2] : memref<192x128xbf16, #tpu.memory_space<vmem>>, vector<192x128xbf16>
    %cst = arith.constant dense<0.000000e+00> : vector<28x128xf32>
    %2 = tpu.matmul %0, %1, %cst {dimension_numbers = #tpu.dot_dimension_numbers<[1], [0], [0], [1], [0, 0, 1, 1], [], []>} : vector<28x192xbf16>, vector<192x128xbf16>, vector<28x128xf32> -> vector<28x128xf32>
    %c0_3 = arith.constant 0 : index
    %c0_4 = arith.constant 0 : index
    %3 = vector.load %arg4[%c0_3, %c0_4] : memref<1x128xf32, #tpu.memory_space<vmem>>, vector<1x128xf32>
    %4 = vector.broadcast %3 : vector<1x128xf32> to vector<28x128xf32>
    %5 = arith.addf %2, %4 : vector<28x128xf32>
    %cst_5 = arith.constant dense<0.000000e+00> : vector<128xf32>
    %6 = vector.multi_reduction <add>, %5, %cst_5 [0] : vector<28x128xf32> to vector<128xf32>
    %7 = vector.shape_cast %6 : vector<128xf32> to vector<1x128xf32>
    %8 = arith.mulf %5, %5 : vector<28x128xf32>
    %cst_6 = arith.constant dense<0.000000e+00> : vector<128xf32>
    %9 = vector.multi_reduction <add>, %8, %cst_6 [0] : vector<28x128xf32> to vector<128xf32>
    %10 = vector.shape_cast %9 : vector<128xf32> to vector<1x128xf32>
    %11 = tpu.iota {dimensions = array<i32: 0>} : vector<2x128xi32>
    %c0_i32 = arith.constant 0 : i32
    %12 = vector.broadcast %c0_i32 : i32 to vector<2x128xi32>
    %13 = arith.cmpi eq, %11, %12 : vector<2x128xi32>
    %14 = vector.shape_cast %7 : vector<1x128xf32> to vector<1x128xf32>
    %15 = vector.broadcast %14 : vector<1x128xf32> to vector<2x128xf32>
    %16 = vector.shape_cast %10 : vector<1x128xf32> to vector<1x128xf32>
    %17 = vector.broadcast %16 : vector<1x128xf32> to vector<2x128xf32>
    %18 = arith.select %13, %15, %17 : vector<2x128xi1>, vector<2x128xf32>
    %c0_7 = arith.constant 0 : index
    %c0_8 = arith.constant 0 : index
    %19 = vector.load %arg7[%c0_7, %c0_8] : memref<128x128xf32, #tpu.memory_space<vmem>>, vector<128x128xf32>
    %cst_9 = arith.constant dense<0.000000e+00> : vector<2x128xf32>
    %20 = tpu.matmul %18, %19, %cst_9 {dimension_numbers = #tpu.dot_dimension_numbers<[1], [0], [0], [1], [0, 0, 1, 1], [], []>} : vector<2x128xf32>, vector<128x128xf32>, vector<2x128xf32> -> vector<2x128xf32>
    %21 = vector.extract_strided_slice %20 {offsets = [0, 0], sizes = [1, 128], strides = [1, 1]} : vector<2x128xf32> to vector<1x128xf32>
    %22 = vector.extract_strided_slice %20 {offsets = [1, 0], sizes = [1, 128], strides = [1, 1]} : vector<2x128xf32> to vector<1x128xf32>
    %23 = arith.mulf %21, %21 : vector<1x128xf32>
    %24 = arith.subf %22, %23 : vector<1x128xf32>
    %cst_10 = arith.constant 0.000000e+00 : f32
    %25 = vector.broadcast %cst_10 : f32 to vector<1x128xf32>
    %26 = arith.maximumf %24, %25 : vector<1x128xf32>
    %c0_11 = arith.constant 0 : index
    %c0_12 = arith.constant 0 : index
    %27 = vector.load %arg5[%c0_11, %c0_12] : memref<1x128xf32, #tpu.memory_space<vmem>>, vector<1x128xf32>
    %cst_13 = arith.constant 9.99999974E-6 : f32
    %28 = vector.broadcast %cst_13 : f32 to vector<1x128xf32>
    %29 = arith.addf %26, %28 : vector<1x128xf32>
    %30 = math.rsqrt %29 : vector<1x128xf32>
    %31 = arith.mulf %27, %30 : vector<1x128xf32>
    %c0_14 = arith.constant 0 : index
    %c0_15 = arith.constant 0 : index
    %32 = vector.load %arg6[%c0_14, %c0_15] : memref<1x128xf32, #tpu.memory_space<vmem>>, vector<1x128xf32>
    %33 = arith.mulf %21, %31 : vector<1x128xf32>
    %34 = arith.subf %32, %33 : vector<1x128xf32>
    %35 = vector.broadcast %31 : vector<1x128xf32> to vector<28x128xf32>
    %36 = arith.mulf %5, %35 : vector<28x128xf32>
    %37 = vector.broadcast %34 : vector<1x128xf32> to vector<28x128xf32>
    %38 = arith.addf %36, %37 : vector<28x128xf32>
    %cst_16 = arith.constant 0.000000e+00 : f32
    %39 = vector.broadcast %cst_16 : f32 to vector<28x128xf32>
    %40 = arith.maximumf %38, %39 : vector<28x128xf32>
    %c0_17 = arith.constant 0 : index
    %c0_18 = arith.constant 0 : index
    %41 = vector.load %arg3[%c0_17, %c0_18] : memref<72x28xbf16, #tpu.memory_space<vmem>>, vector<72x28xbf16>
    %42 = arith.truncf %40 : vector<28x128xf32> to vector<28x128xbf16>
    %cst_19 = arith.constant dense<0.000000e+00> : vector<72x128xf32>
    %43 = tpu.matmul %41, %42, %cst_19 {dimension_numbers = #tpu.dot_dimension_numbers<[1], [0], [0], [1], [0, 0, 1, 1], [], []>} : vector<72x28xbf16>, vector<28x128xbf16>, vector<72x128xf32> -> vector<72x128xf32>
    %44 = vector.extract_strided_slice %43 {offsets = [0, 0], sizes = [24, 128], strides = [1, 1]} : vector<72x128xf32> to vector<24x128xf32>
    %45 = vector.extract_strided_slice %43 {offsets = [24, 0], sizes = [24, 128], strides = [1, 1]} : vector<72x128xf32> to vector<24x128xf32>
    %46 = vector.extract_strided_slice %43 {offsets = [48, 0], sizes = [24, 128], strides = [1, 1]} : vector<72x128xf32> to vector<24x128xf32>
    %47 = tpu.concatenate %44, %45, %46 in 1 : vector<24x128xf32>, vector<24x128xf32>, vector<24x128xf32> -> vector<24x384xf32>
    %48 = arith.truncf %47 : vector<24x384xf32> to vector<24x384xbf16>
    %c0_20 = arith.constant 0 : index
    %c0_21 = arith.constant 0 : index
    %49 = vector.load %arg2[%c0_20, %c0_21] : memref<384x128xbf16, #tpu.memory_space<vmem>>, vector<384x128xbf16>
    %cst_22 = arith.constant dense<0.000000e+00> : vector<24x128xf32>
    %50 = tpu.matmul %48, %49, %cst_22 {dimension_numbers = #tpu.dot_dimension_numbers<[1], [0], [0], [1], [0, 0, 1, 1], [], []>} : vector<24x384xbf16>, vector<384x128xbf16>, vector<24x128xf32> -> vector<24x128xf32>
    %c0_23 = arith.constant 0 : index
    %c0_24 = arith.constant 0 : index
    %51 = vector.load %arg8[%c0_23, %c0_24] : memref<1x128xf32, #tpu.memory_space<vmem>>, vector<1x128xf32>
    %52 = vector.broadcast %51 : vector<1x128xf32> to vector<24x128xf32>
    %53 = arith.addf %50, %52 : vector<24x128xf32>
    %cst_25 = arith.constant dense<0.000000e+00> : vector<128xf32>
    %54 = vector.multi_reduction <add>, %53, %cst_25 [0] : vector<24x128xf32> to vector<128xf32>
    %55 = vector.shape_cast %54 : vector<128xf32> to vector<1x128xf32>
    %56 = arith.mulf %53, %53 : vector<24x128xf32>
    %cst_26 = arith.constant dense<0.000000e+00> : vector<128xf32>
    %57 = vector.multi_reduction <add>, %56, %cst_26 [0] : vector<24x128xf32> to vector<128xf32>
    %58 = vector.shape_cast %57 : vector<128xf32> to vector<1x128xf32>
    %59 = tpu.iota {dimensions = array<i32: 0>} : vector<2x128xi32>
    %c0_i32_27 = arith.constant 0 : i32
    %60 = vector.broadcast %c0_i32_27 : i32 to vector<2x128xi32>
    %61 = arith.cmpi eq, %59, %60 : vector<2x128xi32>
    %62 = vector.shape_cast %55 : vector<1x128xf32> to vector<1x128xf32>
    %63 = vector.broadcast %62 : vector<1x128xf32> to vector<2x128xf32>
    %64 = vector.shape_cast %58 : vector<1x128xf32> to vector<1x128xf32>
    %65 = vector.broadcast %64 : vector<1x128xf32> to vector<2x128xf32>
    %66 = arith.select %61, %63, %65 : vector<2x128xi1>, vector<2x128xf32>
    %c0_28 = arith.constant 0 : index
    %c0_29 = arith.constant 0 : index
    %67 = vector.load %arg11[%c0_28, %c0_29] : memref<128x128xf32, #tpu.memory_space<vmem>>, vector<128x128xf32>
    %cst_30 = arith.constant dense<0.000000e+00> : vector<2x128xf32>
    %68 = tpu.matmul %66, %67, %cst_30 {dimension_numbers = #tpu.dot_dimension_numbers<[1], [0], [0], [1], [0, 0, 1, 1], [], []>} : vector<2x128xf32>, vector<128x128xf32>, vector<2x128xf32> -> vector<2x128xf32>
    %69 = vector.extract_strided_slice %68 {offsets = [0, 0], sizes = [1, 128], strides = [1, 1]} : vector<2x128xf32> to vector<1x128xf32>
    %70 = vector.extract_strided_slice %68 {offsets = [1, 0], sizes = [1, 128], strides = [1, 1]} : vector<2x128xf32> to vector<1x128xf32>
    %71 = arith.mulf %69, %69 : vector<1x128xf32>
    %72 = arith.subf %70, %71 : vector<1x128xf32>
    %cst_31 = arith.constant 0.000000e+00 : f32
    %73 = vector.broadcast %cst_31 : f32 to vector<1x128xf32>
    %74 = arith.maximumf %72, %73 : vector<1x128xf32>
    %c0_32 = arith.constant 0 : index
    %c0_33 = arith.constant 0 : index
    %75 = vector.load %arg9[%c0_32, %c0_33] : memref<1x128xf32, #tpu.memory_space<vmem>>, vector<1x128xf32>
    %cst_34 = arith.constant 9.99999974E-6 : f32
    %76 = vector.broadcast %cst_34 : f32 to vector<1x128xf32>
    %77 = arith.addf %74, %76 : vector<1x128xf32>
    %78 = math.rsqrt %77 : vector<1x128xf32>
    %79 = arith.mulf %75, %78 : vector<1x128xf32>
    %c0_35 = arith.constant 0 : index
    %c0_36 = arith.constant 0 : index
    %80 = vector.load %arg10[%c0_35, %c0_36] : memref<1x128xf32, #tpu.memory_space<vmem>>, vector<1x128xf32>
    %81 = arith.mulf %69, %79 : vector<1x128xf32>
    %82 = arith.subf %80, %81 : vector<1x128xf32>
    %83 = vector.broadcast %79 : vector<1x128xf32> to vector<24x128xf32>
    %84 = arith.mulf %53, %83 : vector<24x128xf32>
    %85 = vector.broadcast %82 : vector<1x128xf32> to vector<24x128xf32>
    %86 = arith.addf %84, %85 : vector<24x128xf32>
    %cst_37 = arith.constant 0.000000e+00 : f32
    %87 = vector.broadcast %cst_37 : f32 to vector<24x128xf32>
    %88 = arith.maximumf %86, %87 : vector<24x128xf32>
    %c0_38 = arith.constant 0 : index
    %c0_39 = arith.constant 0 : index
    %89 = vector.load %arg16[%c0_38, %c0_39] : memref<24x128xf32, #tpu.memory_space<vmem>>, vector<24x128xf32>
    tpu.vector_store %arg16[%c0_38, %c0_39], %88 {strides = array<i32>} : memref<24x128xf32, #tpu.memory_space<vmem>>, vector<24x128xf32>,
    %c0_40 = arith.constant 0 : index
    %c0_41 = arith.constant 0 : index
    %90 = vector.load %arg12[%c0_40, %c0_41] : memref<12x24xbf16, #tpu.memory_space<vmem>>, vector<12x24xbf16>
    %91 = arith.extf %90 : vector<12x24xbf16> to vector<12x24xf32>
    %cst_42 = arith.constant dense<0.000000e+00> : vector<12x128xf32>
    %92 = tpu.matmul %91, %88, %cst_42 {dimension_numbers = #tpu.dot_dimension_numbers<[1], [0], [0], [1], [0, 0, 1, 1], [], []>} : vector<12x24xf32>, vector<24x128xf32>, vector<12x128xf32> -> vector<12x128xf32>
    %c0_43 = arith.constant 0 : index
    %c0_44 = arith.constant 0 : index
    %93 = vector.load %arg13[%c0_43, %c0_44] : memref<12x24xbf16, #tpu.memory_space<vmem>>, vector<12x24xbf16>
    %94 = arith.extf %93 : vector<12x24xbf16> to vector<12x24xf32>
    %cst_45 = arith.constant dense<0.000000e+00> : vector<12x128xf32>
    %95 = tpu.matmul %94, %88, %cst_45 {dimension_numbers = #tpu.dot_dimension_numbers<[1], [0], [0], [1], [0, 0, 1, 1], [], []>} : vector<12x24xf32>, vector<24x128xf32>, vector<12x128xf32> -> vector<12x128xf32>
    %96 = arith.maximumf %92, %95 : vector<12x128xf32>
    %c120_i32 = arith.constant 120 : i32
    %97 = tpu.dynamic_rotate %96 by %c120_i32 dim 1 : vector<12x128xf32>, i32 -> vector<12x128xf32>
    %98 = arith.maximumf %96, %97 : vector<12x128xf32>
    %c0_46 = arith.constant 0 : index
    %c0_47 = arith.constant 0 : index
    %99 = vector.load %arg14[%c0_46, %c0_47] : memref<128x128xbf16, #tpu.memory_space<vmem>>, vector<128x128xbf16>
    %100 = arith.extf %99 : vector<128x128xbf16> to vector<128x128xf32>
    %cst_48 = arith.constant dense<0.000000e+00> : vector<12x128xf32>
    %101 = tpu.matmul %98, %100, %cst_48 {dimension_numbers = #tpu.dot_dimension_numbers<[1], [0], [0], [1], [0, 0, 1, 1], [], []>} : vector<12x128xf32>, vector<128x128xf32>, vector<12x128xf32> -> vector<12x128xf32>
    %c0_49 = arith.constant 0 : index
    %c0_50 = arith.constant 0 : index
    %102 = vector.load %arg15[%c0_49, %c0_50] : memref<12x128xf32, #tpu.memory_space<vmem>>, vector<12x128xf32>
    tpu.vector_store %arg15[%c0_49, %c0_50], %101 {strides = array<i32>} : memref<12x128xf32, #tpu.memory_space<vmem>>, vector<12x128xf32>,
    return
  }
}

</mosaic_0001>

<bundles_post_ra>
// kernel: encoder_block_2d.1
= control target key start
LH: loop header
LB: loop body
LE: loop exit
PB: predicated region body
PF: predicated region fallthrough
CT: control target
= control target key end

     0   :  { %v1807_v0 = vmov 0   ;;  %v1808_v2 = vmov 0.0|0.0   ;;  %vm178_vm0 = vcmask 523264   ;;  %vm1809_vm1 = vmmov 0   ;;  %s1812_s24 = smov 120   ;;  %s2281_s1 = inlined_call_operand.vmem [shape: bf16[192,128], index: 1, kind: input, shape index: {}]   ;;  %s2282_s0 = inlined_call_operand.vmem [shape: bf16[28,192], index: 0, kind: input, shape index: {}]   ;;  %s2283_s7 = inlined_call_operand.vmem [shape: f32[128,128], index: 7, kind: input, shape index: {}]   ;;  %s2284_s4 = inlined_call_operand.vmem [shape: f32[1,128], index: 4, kind: input, shape index: {}]   ;;  %s2285_s3 = inlined_call_operand.vmem [shape: bf16[72,28], index: 3, kind: input, shape index: {}]   ;;  %s2286_s2 = inlined_call_operand.vmem [shape: bf16[384,128], index: 2, kind: input, shape index: {}]   ;;  %s2287_s5 = inlined_call_operand.vmem [shape: f32[1,128], index: 5, kind: input, shape index: {}]   ;;  %s2288_s6 = inlined_call_operand.vmem [shape: f32[1,128], index: 6, kind: input, shape index: {}]   ;;  %s2289_s11 = inlined_call_operand.vmem [shape: f32[128,128], index: 11, kind: input, shape index: {}]   ;;  %s2290_s8 = inlined_call_operand.vmem [shape: f32[1,128], index: 8, kind: input, shape index: {}]   ;;  %s2291_s12 = inlined_call_operand.vmem [shape: bf16[12,24], index: 12, kind: input, shape index: {}]   ;;  %s2292_s13 = inlined_call_operand.vmem [shape: bf16[12,24], index: 13, kind: input, shape index: {}]   ;;  %s2293_s9 = inlined_call_operand.vmem [shape: f32[1,128], index: 9, kind: input, shape index: {}]   ;;  %s2294_s10 = inlined_call_operand.vmem [shape: f32[1,128], index: 10, kind: input, shape index: {}]   ;;  %s2295_s16 = inlined_call_operand.vmem [shape: f32[24,128], index: 16, kind: output, shape index: {1}]   ;;  %s2296_s14 = inlined_call_operand.vmem [shape: bf16[128,128], index: 14, kind: input, shape index: {}]   ;;  %s2297_s15 = inlined_call_operand.vmem [shape: f32[12,128], index: 15, kind: output, shape index: {0}]  }
   0x1   :  { %2299 = sst [smem:[#allocation2_spill]] %s2281_s1  ;;  %185 = vmatprep.subr.bf16.mxu0 %v1807_v0  ;;  %1657 = vmatprep.subr.bf16.mxu1 %v1808_v2  ;;  %v1770_v6 = vld [vmem:[%s2282_s0 + $0x4] ss:$8 sps:$4 sm:$0xff]   ;;  %v1768_v15 = vld [vmem:[%s2282_s0] ss:$8 sps:$4 sm:$0xff]   ;;  %v265_v21 = vld [vmem:[%s2283_s7 + $0x10] sm:$0xff] }
   0x2   :  { %s2300_s23 = sld [smem:[#allocation2_spill]]  ;;  %1303 = vmatprep.mubr.msk.bf16.mxu0 %vm178_vm0, %v1770_v6  ;;  %v1771_v16 = vld [vmem:[%s2282_s0 + $0x14] ss:$8 sps:$4 sm:$0x3f]   ;;  %v263_v18 = vld [vmem:[%s2283_s7] sm:$0xff]  ;;  %v264_v19 = vld [vmem:[%s2283_s7 + $0x8] sm:$0xff] }
   0x3   :  { %v1773_v17 = vld [vmem:[%s2282_s0 + $0x10] ss:$8 sps:$4 sm:$0x3f]   ;;  %v1658_v20 = vpack.c.bf16 %v264_v19, %v263_v18  ;;  %v267_v24 = vld [vmem:[%s2283_s7 + $0x20] sm:$0xff]  ;;  %v268_v25 = vld [vmem:[%s2283_s7 + $0x28] sm:$0xff]  ;;  %v1810_v41 = vmov 0.0  }
   0x4   :  { %v266_v22 = vld [vmem:[%s2283_s7 + $0x18] sm:$0xff]  ;;  %v1664_v26 = vpack.c.bf16 %v268_v25, %v267_v24  ;;  %v269_v27 = vld [vmem:[%s2283_s7 + $0x30] sm:$0xff]  ;;  %v271_v30 = vld [vmem:[%s2283_s7 + $0x40] sm:$0xff]  ;;  %1522 = vmatprep.mubr.msk.f32.mxu1 %vm1809_vm1, %v1810_v41  ;;  %vm236_vm2 = vcmask 1043456   ;;  %vm453_vm4 = vcmask 1045504   ;;  %vm437_vm5 = vcmask 228352  }
   0x5   :  { %1659 = vmatpush3.bf16.msra.mxu1 %v1658_v20  ;;  %v1661_v23 = vpack.c.bf16 %v266_v22, %v265_v21  ;;  %v270_v28 = vld [vmem:[%s2283_s7 + $0x38] sm:$0xff]  ;;  %v272_v31 = vld [vmem:[%s2283_s7 + $0x48] sm:$0xff]  ;;  %v273_v33 = vld [vmem:[%s2283_s7 + $0x50] sm:$0xff]  ;;  %vm994_vm6 = vcmask 195584  }
   0x6   :  { %1660 = vmatprep.subr.bf16.mxu1 %v1808_v2  ;;  %v1667_v29 = vpack.c.bf16 %v270_v28, %v269_v27  ;;  %v1670_v32 = vpack.c.bf16 %v272_v31, %v271_v30  ;;  %v274_v34 = vld [vmem:[%s2283_s7 + $0x58] sm:$0xff]  ;;  %v275_v36 = vld [vmem:[%s2283_s7 + $0x60] sm:$0xff]  ;;  %v276_v37 = vld [vmem:[%s2283_s7 + $0x68] sm:$0xff] }
   0x7   :  { %v1673_v35 = vpack.c.bf16 %v274_v34, %v273_v33  ;;  %v1676_v38 = vpack.c.bf16 %v276_v37, %v275_v36  ;;  %v277_v39 = vld [vmem:[%s2283_s7 + $0x70] sm:$0xff]  ;;  %v278_v40 = vld [vmem:[%s2283_s7 + $0x78] sm:$0xff]  ;;  %v1286_v45 = vld [vmem:[%s2284_s4] ss:$0 sm:$0xff]  ;;  %v1811_v33 = vmov 1966171168  }
   0x8   :  { %v1756_v1 = vld [vmem:[%s2300_s23] sm:$0xff]   ;;  %v1757_v3 = vld [vmem:[%s2300_s23 + $0x8] sm:$0xff]   ;;  %v1758_v4 = vld [vmem:[%s2300_s23 + $0x10] sm:$0xff]   ;;  %v1679_v42 = vpack.c.bf16 %v278_v40, %v277_v39  ;;  %v360_v34 = vunpack.c.l.s4 %v1811_v33 }
   0x9   :  { %186 = vmatpush1.bf16.msra.mxu0 %v1756_v1  ;;  %v1759_v5 = vld [vmem:[%s2300_s23 + $0x18] sm:$0xff]   ;;  %v1760_v7 = vld [vmem:[%s2300_s23 + $0x20] sm:$0xff]   ;;  %v1761_v8 = vld [vmem:[%s2300_s23 + $0x28] sm:$0xff]   ;;  %1662 = vmatpush3.bf16.msra.mxu1 %v1661_v23 }
   0xa   :  { %187 = vmatprep.subr.bf16.mxu0 %v1807_v0  ;;  %v1762_v9 = vld [vmem:[%s2300_s23 + $0x30] sm:$0xff]   ;;  %v1763_v10 = vld [vmem:[%s2300_s23 + $0x38] sm:$0xff]   ;;  %v1764_v11 = vld [vmem:[%s2300_s23 + $0x40] sm:$0xff]   ;;  %1663 = vmatprep.subr.bf16.mxu1 %v1808_v2 }
   0xb   :  { %v1765_v12 = vld [vmem:[%s2300_s23 + $0x48] sm:$0xff]   ;;  %v1766_v13 = vld [vmem:[%s2300_s23 + $0x50] sm:$0xff]   ;;  %v1767_v14 = vld [vmem:[%s2300_s23 + $0x58] sm:$0xff]  }
   0xc   :  { %v1779_v20 = vld [vmem:[%s2286_s2 + $0x40] sm:$0xff]   ;;  %v1781_v22 = vld [vmem:[%s2286_s2 + $0x48] sm:$0xff]   ;;  %v1783_v24 = vld [vmem:[%s2286_s2 + $0x50] sm:$0xff]  }
   0xd   :  { %188 = vmatpush1.bf16.msra.mxu0 %v1757_v3  ;;  %1665 = vmatpush3.bf16.msra.mxu1 %v1664_v26  ;;  %v1780_v21 = vld [vmem:[%s2286_s2] sm:$0xff]   ;;  %v1782_v23 = vld [vmem:[%s2286_s2 + $0x8] sm:$0xff]   ;;  %v1784_v25 = vld [vmem:[%s2286_s2 + $0x10] sm:$0xff]  }
   0xe   :  { %189 = vmatprep.subr.bf16.mxu0 %v1807_v0  ;;  %1666 = vmatprep.subr.bf16.mxu1 %v1808_v2  ;;  %v355_v40 = vld [vmem:[%s2287_s5] sm:$0x1] }
  0x11   :  { %190 = vmatpush1.bf16.msra.mxu0 %v1758_v4  ;;  %1668 = vmatpush3.bf16.msra.mxu1 %v1667_v29 }
  0x12   :  { %191 = vmatprep.subr.bf16.mxu0 %v1807_v0  ;;  %1669 = vmatprep.subr.bf16.mxu1 %v1808_v2 }
  0x15   :  { %192 = vmatpush1.bf16.msra.mxu0 %v1759_v5  ;;  %1671 = vmatpush3.bf16.msra.mxu1 %v1670_v32 }
  0x16   :  { %193 = vmatprep.subr.bf16.mxu0 %v1807_v0  ;;  %1672 = vmatprep.subr.bf16.mxu1 %v1808_v2 }
  0x19   :  { %194 = vmatpush1.bf16.msra.mxu0 %v1760_v7  ;;  %1674 = vmatpush3.bf16.msra.mxu1 %v1673_v35  ;;  %v361_v35 = vunpack.c.0.s8 %v360_v34 }
  0x1a   :  { %195 = vmatprep.subr.bf16.mxu0 %v1807_v0  ;;  %1675 = vmatprep.subr.bf16.mxu1 %v1808_v2 }
  0x1d   :  { %196 = vmatpush1.bf16.msra.mxu0 %v1761_v8  ;;  %1677 = vmatpush3.bf16.msra.mxu1 %v1676_v38  ;;  %v259_v8 = vlaneseq }
  0x1e   :  { %197 = vmatprep.subr.bf16.mxu0 %v1807_v0  ;;  %1678 = vmatprep.subr.bf16.mxu1 %v1808_v2 }
  0x21   :  { %198 = vmatpush1.bf16.msra.mxu0 %v1762_v9  ;;  %1680 = vmatpush3.bf16.msra.mxu1 %v1679_v42 }
  0x22   :  { %199 = vmatprep.subr.bf16.mxu0 %v1807_v0  ;;  %1525 = vmatprep.subr.bf16.mxu1 %v1810_v41 }
  0x25   :  { %200 = vmatpush1.bf16.msra.mxu0 %v1763_v10 }
  0x26   :  { %201 = vmatprep.subr.bf16.mxu0 %v1807_v0 }
  0x29   :  { %202 = vmatpush1.bf16.msra.mxu0 %v1764_v11 }
  0x2a   :  { %203 = vmatprep.subr.bf16.mxu0 %v1807_v0 }
  0x2d   :  { %204 = vmatpush1.bf16.msra.mxu0 %v1765_v12 }
  0x2e   :  { %205 = vmatprep.subr.bf16.mxu0 %v1807_v0 }
  0x31   :  { %206 = vmatpush1.bf16.msra.mxu0 %v1766_v13  ;;  %v2030_v13 = vshrl.u32 %v259_v8, 7  ;;  %v1786_v8 = vld [vmem:[%s2286_s2 + $0x58] sm:$0xff]  }
  0x32   :  { %207 = vmatprep.subr.bf16.mxu0 %v1807_v0 }
  0x33   :  { %vm261_vm3 = vcmp.eq.s32.totalorder %v2030_v13, 0  ;;  %v2056_v36 = vsub.s32 %v361_v35, %v2030_v13  ;;  %v2063_v42 = vsub.s32 0, %v2030_v13 }
  0x35   :  { %208 = vmatpush1.bf16.msra.mxu0 %v1767_v14 }
  0x36   :  { %1407 = vmatprep.subr.bf16.mxu0 %v1779_v20  ;;  %v1797_v20 = vld [vmem:[%s2286_s2 + $0x78] sm:$0xff]  }
  0x38   :  { %218 = vmatmul.mubr.bf16.vlgmr.msra.gmra.mrb[0].mxu0 %v1768_v15 }
  0x39   :  { %1304 = vmatprep.mubr.msk.bf16.mxu0 %vm178_vm0, %v1771_v16  ;;  %1408 = vmatpush3.bf16.msra.mxu0 %v1780_v21  ;;  %v1798_v21 = vld [vmem:[%s2286_s2 + $0x38] sm:$0xff]  }
  0x3a   :  { %1409 = vmatprep.subr.bf16.mxu0 %v1781_v22  ;;  %v1799_v22 = vld [vmem:[%s2286_s2 + $0xa0] sm:$0xff]  }
  0x3d   :  { %1410 = vmatpush3.bf16.msra.mxu0 %v1782_v23  ;;  %v1800_v23 = vld [vmem:[%s2286_s2 + $0xa8] sm:$0xff]  }
  0x3e   :  { %1411 = vmatprep.subr.bf16.mxu0 %v1783_v24  ;;  %v1801_v24 = vld [vmem:[%s2286_s2 + $0xb0] sm:$0xff]  }
  0x40   :  { %226 = vmatmul.mubr.bf16.gmra.mrb[4].mxu0 %v1773_v17 }
  0x41   :  { %1412 = vmatpush3.bf16.msra.mxu0 %v1784_v25  ;;  %v1802_v25 = vld [vmem:[%s2286_s2 + $0xb8] sm:$0xff]  }
  0x42   :  { %1413 = vmatprep.subr.bf16.mxu0 %v1786_v8 }
 0x10b   :  { %v219_v43 = vpop.f32.mrb[0].mxu0 }
 0x10c   :  { %v221_v44 = vpop.f32.mrb[1].mxu0  ;;  %v2012_v49 = vadd.f32 %v1286_v45, %v219_v43 }
 0x10d   :  { %v222_v46 = vpop.f32.mrb[2].mxu0 }
 0x10e   :  { %v2010_v47 = vadd.f32 %v1286_v45, %v222_v46  ;;  %v224_v48 = vpop.f32.mrb[3].mxu0  ;;  %v245_v52 = vmul.f32 %v2012_v49, %v2012_v49 }
 0x110   :  { %v246_v50 = vmul.f32 %v2010_v47, %v2010_v47  ;;  %v234_v53 = vadd.f32 %v2010_v47, %v2012_v49 }
 0x112   :  { %v249_v57 = vadd.f32 %v246_v50, %v245_v52 }
 0x113   :  { %v227_v51 = vpop.f32.mrb[4].mxu0 }
 0x114   :  { %v2020_v54 = vadd.f32 %v1286_v45, %v227_v51  ;;  %v229_v55 = vpop.f32.mrb[5].mxu0 }
 0x115   :  { %v230_v56 = vpop.f32.mrb[6].mxu0 }
 0x116   :  { %v235_v58 = vadd.f32 %v234_v53, %v2020_v54  ;;  %v247_v59 = vmul.f32 %v2020_v54, %v2020_v54  ;;  %v2025_v60 = vadd.f32 %v1286_v45, %v230_v56  ;;  %v232_v61 = vpop.f32.mrb[7].mxu0  ;;  %v376_v45 = vld [vmem:[%s2288_s6] sm:$0x1] }
 0x118   :  { %v250_v62 = vadd.f32 %v249_v57, %v247_v59  ;;  %v237_v63 = vsel %vm236_vm2, %v2025_v60, 0.0  ;;  %v248_v0 = vmul.f32 %v2025_v60, %v2025_v60 }
 0x119   :  { %v238_v1 = vadd.f32 %v237_v63, %v235_v58 }
 0x11a   :  { %v251_v3 = vsel %vm236_vm2, %v248_v0, 0.0 }
 0x11b   :  { %v239_v4 = vrot.slane %v238_v1, 4  ;;  %v252_v5 = vadd.f32 %v251_v3, %v250_v62 }
 0x11d   :  { %v240_v6 = vadd.f32 %v239_v4, %v238_v1  ;;  %v253_v7 = vrot.slane %v252_v5, 4 }
 0x11f   :  { %v241_v9 = vrot.slane %v240_v6, 2  ;;  %v254_v10 = vadd.f32 %v253_v7, %v252_v5  ;;  %v1776_v5 = vld [vmem:[%s2285_s3 + $0x10] sm:$0xff]   ;;  %v1778_v7 = vld [vmem:[%s2285_s3 + $0x20] ss:$0 sps:$4 sm:$0xff]  }
 0x121   :  { %v242_v11 = vadd.f32 %v241_v9, %v240_v6  ;;  %v255_v12 = vrot.slane %v254_v10, 2  ;;  %v1777_v6 = vld [vmem:[%s2285_s3 + $0x18] sm:$0xff]  }
 0x122   :  { %v1787_v9 = vld [vmem:[%s2286_s2 + $0x18] sm:$0xff]  }
 0x123   :  { %v243_v14 = vrot.slane %v242_v11, 1  ;;  %v256_v15 = vadd.f32 %v255_v12, %v254_v10  ;;  %1414 = vmatpush3.bf16.msra.mxu0 %v1787_v9  ;;  %v1788_v10 = vld [vmem:[%s2286_s2 + $0x88] sm:$0xff]   ;;  %v1790_v12 = vld [vmem:[%s2286_s2 + $0x20] sm:$0xff]  }
 0x124   :  { %v862_v9 = vld [vmem:[%s2289_s11 + $0x60] sm:$0xff] }
 0x125   :  { %v257_v16 = vrot.slane %v256_v15, 1  ;;  %v244_v17 = vadd.f32 %v243_v14, %v242_v11  ;;  %v1789_v11 = vld [vmem:[%s2286_s2 + $0x60] sm:$0xff]   ;;  %v1791_v14 = vld [vmem:[%s2286_s2 + $0x90] sm:$0xff]  }
 0x126   :  { %1415 = vmatprep.subr.bf16.mxu0 %v1789_v11  ;;  %v864_v11 = vld [vmem:[%s2289_s11 + $0x70] sm:$0xff] }
 0x127   :  { %v258_v18 = vadd.f32 %v257_v16, %v256_v15  ;;  %1416 = vmatpush3.bf16.msra.mxu0 %v1790_v12  ;;  %v1792_v15 = vld [vmem:[%s2286_s2 + $0x68] sm:$0xff]  }
 0x128   :  { %v1793_v16 = vld [vmem:[%s2286_s2 + $0x28] sm:$0xff]   ;;  %1417 = vmatprep.subr.bf16.mxu0 %v1792_v15 }
 0x129   :  { %v262_v19 = vsel %vm261_vm3, %v244_v17, %v258_v18  ;;  %v1794_v17 = vld [vmem:[%s2286_s2 + $0x70] sm:$0xff]   ;;  %v1795_v18 = vld [vmem:[%s2286_s2 + $0x98] sm:$0xff]  }
 0x12a   :  { %1523 = vmatmul.mubr.f32.vlgmr.msra.gmra.mrb[0].mxu1 %v262_v19  ;;  %v1796_v19 = vld [vmem:[%s2286_s2 + $0x30] sm:$0xff]  }
 0x12b   :  { %1529 = vmatprep.mubr.msk.bf16.mxu1 %vm1809_vm1, %v1810_v41  ;;  %1418 = vmatpush3.bf16.msra.mxu0 %v1793_v16 }
 0x12c   :  { %1419 = vmatprep.subr.bf16.mxu0 %v1794_v17 }
 0x12f   :  { %1420 = vmatpush3.bf16.msra.mxu0 %v1796_v19 }
 0x130   :  { %1421 = vmatprep.subr.bf16.mxu0 %v1797_v20 }
 0x133   :  { %1422 = vmatpush3.bf16.msra.mxu0 %v1798_v21 }
 0x134   :  { %1681 = vmatprep.subr.bf16.mxu0 %v1808_v2 }
 0x1fd   :  { %v345_v26 = vpop.f32.mrb[0].mxu1 }
 0x1fe   :  { %v349_v27 = vmul.f32 %v345_v26, %v345_v26  ;;  %v1524_v28 = vpop.f32.mrb[1].mxu1 }
 0x200   :  { %v351_v29 = vrot.slane %v349_v27, 7 }
 0x202   :  { %v353_v30 = vsub.f32 %v345_v26, %v351_v29 }
 0x204   :  { %v354_v31 = vmax.f32 %v353_v30, 0.0 }
 0x206   :  { %v356_v32 = vadd.f32 1e-05, %v354_v31 }
 0x208   :  { %1803 = vrsqrt.f32 %v356_v32 }
 0x212   :  { %v1804_v37 = vpop.eup %1803 }
 0x213   :  { %v365_v38 = vrot.slane %v1804_v37, %v2056_v36 }
 0x215   :  { %v366_v39 = vcombine.high %v365_v38, %v365_v38 }
 0x217   :  { %v373_v43 = vrot.slane %v366_v39, %v2056_v36 }
 0x219   :  { %v375_v44 = vmul.f32 %v373_v43, %v355_v40 }
 0x21b   :  { %v377_v46 = vmul.f32 %v375_v44, %v345_v26  ;;  %v383_v48 = vrot.slane %v375_v44, %v2063_v42 }
 0x21d   :  { %v378_v50 = vsub.f32 %v376_v45, %v377_v46  ;;  %v385_v51 = vmul.f32 %v383_v48, %v2012_v49  ;;  %v386_v53 = vmul.f32 %v383_v48, %v2010_v47  ;;  %v387_v55 = vmul.f32 %v383_v48, %v2020_v54  ;;  %v1785_v47 = vld [vmem:[%s2286_s2 + $0x80] sm:$0xff]  }
 0x21e   :  { %v388_v56 = vmul.f32 %v383_v48, %v2025_v60  ;;  %v1774_v54 = vld [vmem:[%s2285_s3] sm:$0xff]   ;;  %v1775_v60 = vld [vmem:[%s2285_s3 + $0x8] sm:$0xff]  }
 0x21f   :  { %v393_v52 = vrot.slane %v378_v50, %v2063_v42 }
 0x221   :  { %v395_v57 = vadd.f32 %v393_v52, %v385_v51  ;;  %v396_v58 = vadd.f32 %v393_v52, %v386_v53  ;;  %v397_v59 = vadd.f32 %v393_v52, %v387_v55  ;;  %v398_v61 = vadd.f32 %v393_v52, %v388_v56 }
 0x223   :  { %v399_v62 = vmax.f32 %v395_v57, 0.0  ;;  %v400_v63 = vmax.f32 %v396_v58, 0.0  ;;  %v401_v0 = vmax.f32 %v397_v59, 0.0  ;;  %v402_v1 = vmax.f32 %v398_v61, 0.0  ;;  %v850_v58 = vld [vmem:[%s2289_s11] sm:$0xff]  ;;  %v851_v59 = vld [vmem:[%s2289_s11 + $0x8] sm:$0xff] }
 0x224   :  { %v1682_v61 = vpack.c.bf16 %v851_v59, %v850_v58 }
 0x225   :  { %v412_v3 = vpack.c.bf16 %v400_v63, %v399_v62  ;;  %v413_v4 = vpack.c.bf16 %v402_v1, %v401_v0  ;;  %v853_v62 = vld [vmem:[%s2289_s11 + $0x18] sm:$0xff]  ;;  %v854_v0 = vld [vmem:[%s2289_s11 + $0x20] sm:$0xff]  ;;  %v855_v1 = vld [vmem:[%s2289_s11 + $0x28] sm:$0xff] }
 0x227   :  { %1526 = vmatpush3.bf16.msra.mxu1 %v412_v3  ;;  %v455_v49 = vsel %vm453_vm4, %v413_v4, 0  ;;  %v1688_v3 = vpack.c.bf16 %v855_v1, %v854_v0  ;;  %v856_v4 = vld [vmem:[%s2289_s11 + $0x30] sm:$0xff]  ;;  %v1076_v0 = vld [vmem:[%s2292_s13] sm:$0xf] }
 0x228   :  { %1527 = vmatprep.subr.bf16.mxu1 %v1810_v41 }
 0x22b   :  { %1528 = vmatpush3.bf16.msra.mxu1 %v455_v49 }
 0x22c   :  { %1549 = vmatprep.subr.bf16.mxu1 %v1785_v47 }
 0x22e   :  { %1530 = vmatmul.mubr.msk.bf16.vlgmr.msra.gmra.mrb[4].mxu1 %vm437_vm5, %v1774_v54  ;;  %v858_v54 = vld [vmem:[%s2289_s11 + $0x40] sm:$0xff] }
 0x22f   :  { %1533 = vmatprep.mubr.msk.bf16.mxu1 %vm1809_vm1, %v1810_v41  ;;  %1550 = vmatpush3.bf16.msra.mxu1 %v1785_v47  ;;  %v857_v47 = vld [vmem:[%s2289_s11 + $0x38] sm:$0xff] }
 0x230   :  { %1551 = vmatprep.subr.bf16.mxu1 %v1788_v10  ;;  %v1691_v49 = vpack.c.bf16 %v857_v47, %v856_v4 }
 0x233   :  { %1552 = vmatpush3.bf16.msra.mxu1 %v1788_v10  ;;  %v863_v10 = vld [vmem:[%s2289_s11 + $0x68] sm:$0xff] }
 0x234   :  { %1553 = vmatprep.subr.bf16.mxu1 %v1791_v14  ;;  %v1700_v12 = vpack.c.bf16 %v863_v10, %v862_v9  ;;  %v942_v9 = vld [vmem:[%s2293_s9] sm:$0x1] }
 0x236   :  { %1534 = vmatmul.mubr.msk.bf16.gmra.mrb[8].mxu1 %vm437_vm5, %v1775_v60  ;;  %v859_v60 = vld [vmem:[%s2289_s11 + $0x48] sm:$0xff] }
 0x237   :  { %1537 = vmatprep.mubr.msk.bf16.mxu1 %vm1809_vm1, %v1810_v41  ;;  %1554 = vmatpush3.bf16.msra.mxu1 %v1791_v14  ;;  %v865_v14 = vld [vmem:[%s2289_s11 + $0x78] sm:$0xff] }
 0x238   :  { %1555 = vmatprep.subr.bf16.mxu1 %v1795_v18  ;;  %v1703_v15 = vpack.c.bf16 %v865_v14, %v864_v11 }
 0x23b   :  { %1556 = vmatpush3.bf16.msra.mxu1 %v1795_v18 }
 0x23c   :  { %1557 = vmatprep.subr.bf16.mxu1 %v1799_v22 }
 0x23e   :  { %1538 = vmatmul.mubr.msk.bf16.gmra.mrb[12].mxu1 %vm437_vm5, %v1776_v5  ;;  %v1694_v5 = vpack.c.bf16 %v859_v60, %v858_v54 }
 0x23f   :  { %1541 = vmatprep.mubr.msk.bf16.mxu1 %vm1809_vm1, %v1810_v41  ;;  %1558 = vmatpush3.bf16.msra.mxu1 %v1799_v22 }
 0x240   :  { %1559 = vmatprep.subr.bf16.mxu1 %v1800_v23 }
 0x243   :  { %1560 = vmatpush3.bf16.msra.mxu1 %v1800_v23 }
 0x244   :  { %1561 = vmatprep.subr.bf16.mxu1 %v1801_v24 }
 0x246   :  { %1542 = vmatmul.mubr.msk.bf16.gmra.mrb[16].mxu1 %vm437_vm5, %v1777_v6  ;;  %v860_v6 = vld [vmem:[%s2289_s11 + $0x50] sm:$0xff] }
 0x247   :  { %1545 = vmatprep.mubr.msk.bf16.mxu1 %vm1809_vm1, %v1810_v41  ;;  %1562 = vmatpush3.bf16.msra.mxu1 %v1801_v24 }
 0x248   :  { %1563 = vmatprep.subr.bf16.mxu1 %v1802_v25 }
 0x24b   :  { %1564 = vmatpush3.bf16.msra.mxu1 %v1802_v25 }
 0x24e   :  { %1546 = vmatmul.mubr.msk.bf16.gmra.mrb[20].mxu1 %vm437_vm5, %v1778_v7  ;;  %v861_v7 = vld [vmem:[%s2289_s11 + $0x58] sm:$0xff] }
 0x24f   :  { %v1697_v8 = vpack.c.bf16 %v861_v7, %v860_v6 }
 0x301   :  { %v491_v26 = vpop.f32.mrb[4].mxu1 }
 0x302   :  { %v1531_v27 = vpop.f32.mrb[5].mxu1 }
 0x303   :  { %v494_v28 = vpop.f32.mrb[6].mxu1  ;;  %v1315_v27 = vld [vmem:[%s2290_s8] ss:$0 sm:$0xff] }
 0x304   :  { %v529_v29 = vpack.c.bf16 %v494_v28, %v491_v26  ;;  %v1532_v30 = vpop.f32.mrb[7].mxu1 }
 0x309   :  { %v499_v31 = vpop.f32.mrb[8].mxu1 }
 0x30a   :  { %v1535_v32 = vpop.f32.mrb[9].mxu1  ;;  %v532_v46 = vpack.c.bf16 %v499_v31, %v499_v31 }
 0x30b   :  { %v502_v33 = vpop.f32.mrb[10].mxu1 }
 0x30c   :  { %v1536_v34 = vpop.f32.mrb[11].mxu1 }
 0x311   :  { %v507_v35 = vpop.f32.mrb[12].mxu1 }
 0x312   :  { %v530_v37 = vpack.c.bf16 %v507_v35, %v502_v33  ;;  %v1539_v38 = vpop.f32.mrb[13].mxu1 }
 0x313   :  { %v510_v39 = vpop.f32.mrb[14].mxu1 }
 0x314   :  { %v533_v40 = vpack.c.bf16 %v510_v39, %v510_v39  ;;  %v1540_v43 = vpop.f32.mrb[15].mxu1  ;;  %766 = vmatprep.mubr.bf16.mxu0 %v530_v37 }
 0x315   :  { %767 = vmatmul.mubr.bf16.vlgmr.msra.gmra.mrb[8].mxu0 %v529_v29 }
 0x316   :  { %774 = vmatprep.mubr.bf16.mxu0 %v533_v40  ;;  %1683 = vmatpush3.bf16.msra.mxu0 %v1682_v61 }
 0x317   :  { %1684 = vmatprep.subr.bf16.mxu0 %v1808_v2 }
 0x319   :  { %v515_v44 = vpop.f32.mrb[16].mxu1 }
 0x31a   :  { %v1543_v45 = vpop.f32.mrb[17].mxu1 }
 0x31b   :  { %v518_v48 = vpop.f32.mrb[18].mxu1 }
 0x31c   :  { %v531_v50 = vpack.c.bf16 %v518_v48, %v515_v44  ;;  %v1544_v51 = vpop.f32.mrb[19].mxu1 }
 0x31d   :  { %775 = vmatmul.mubr.bf16.gmra.mrb[12].mxu0 %v532_v46 }
 0x31e   :  { %1565 = vmatprep.mubr.bf16.mxu1 %v531_v50  ;;  %1601 = vmatprep.mubr.msk.f32.mxu0 %vm1809_vm1, %v1810_v41  ;;  %v852_v41 = vld [vmem:[%s2289_s11 + $0x10] sm:$0xff] }
 0x31f   :  { %v1685_v63 = vpack.c.bf16 %v853_v62, %v852_v41 }
 0x321   :  { %v523_v52 = vpop.f32.mrb[20].mxu1  ;;  %1686 = vmatpush3.bf16.msra.mxu0 %v1685_v63  ;;  %v990_v63 = vld [vmem:[%s2291_s12] sm:$0xf] }
 0x322   :  { %v534_v53 = vpack.c.bf16 %v523_v52, %v523_v52  ;;  %v1547_v55 = vpop.f32.mrb[21].mxu1  ;;  %1687 = vmatprep.subr.bf16.mxu0 %v1808_v2  ;;  %v992_v1 = vunpack.c.l.bf16 %v990_v63 }
 0x323   :  { %v526_v56 = vpop.f32.mrb[22].mxu1 }
 0x324   :  { %v1548_v57 = vpop.f32.mrb[23].mxu1  ;;  %1566 = vmatmul.mubr.bf16.vlgmr.msra.gmra.mrb[24].mxu1 %v534_v53 }
 0x325   :  { %1689 = vmatpush3.bf16.msra.mxu0 %v1688_v3  ;;  %v1078_v3 = vunpack.c.l.bf16 %v1076_v0 }
 0x326   :  { %1690 = vmatprep.subr.bf16.mxu0 %v1808_v2 }
 0x327   :  { %1619 = vmatprep.mubr.msk.f32.mxu1 %vm994_vm6, %v1078_v3 }
 0x329   :  { %1692 = vmatpush3.bf16.msra.mxu0 %v1691_v49 }
 0x32a   :  { %1693 = vmatprep.subr.bf16.mxu0 %v1808_v2 }
 0x32d   :  { %1695 = vmatpush3.bf16.msra.mxu0 %v1694_v5 }
 0x32e   :  { %1696 = vmatprep.subr.bf16.mxu0 %v1808_v2 }
 0x331   :  { %1698 = vmatpush3.bf16.msra.mxu0 %v1697_v8 }
 0x332   :  { %1699 = vmatprep.subr.bf16.mxu0 %v1808_v2 }
 0x335   :  { %1701 = vmatpush3.bf16.msra.mxu0 %v1700_v12  ;;  %v963_v12 = vld [vmem:[%s2294_s10] sm:$0x1] }
 0x336   :  { %1702 = vmatprep.subr.bf16.mxu0 %v1808_v2 }
 0x339   :  { %1704 = vmatpush3.bf16.msra.mxu0 %v1703_v15 }
 0x3e8   :  { %v1423_v16 = vpop.f32.mrb[8].mxu0 }
 0x3e9   :  { %v1424_v17 = vpop.f32.mrb[9].mxu0 }
 0x3ea   :  { %v1425_v18 = vadd.f32 %v1424_v17, %v1423_v16  ;;  %v1426_v19 = vpop.f32.mrb[10].mxu0 }
 0x3eb   :  { %v1427_v20 = vpop.f32.mrb[11].mxu0 }
 0x3ec   :  { %v1428_v21 = vadd.f32 %v1427_v20, %v1426_v19  ;;  %v769_v30 = vadd.f32 %v1425_v18, %v1315_v27 }
 0x3ee   :  { %v772_v34 = vadd.f32 %v1428_v21, %v1315_v27 }
 0x3f0   :  { %v1429_v22 = vpop.f32.mrb[12].mxu0 }
 0x3f1   :  { %v1430_v23 = vpop.f32.mrb[13].mxu0 }
 0x3f2   :  { %v1431_v24 = vadd.f32 %v1430_v23, %v1429_v22  ;;  %v1432_v25 = vpop.f32.mrb[14].mxu0 }
 0x3f3   :  { %v1433_v26 = vpop.f32.mrb[15].mxu0 }
 0x3f4   :  { %v777_v28 = vadd.f32 %v1431_v24, %v1315_v27  ;;  %v1077_v27 = vld [vmem:[%s2292_s13 + $0x4] sm:$0x3] }
 0x3f7   :  { %v1567_v29 = vpop.f32.mrb[24].mxu1 }
 0x3f8   :  { %v825_v2 = vadd.f32 %v1567_v29, %v777_v28  ;;  %v816_v31 = vpop.f32.mrb[25].mxu1  ;;  %v1079_v29 = vunpack.c.l.bf16 %v1077_v27 }
 0x3f9   :  { %v817_v32 = vadd.f32 %v816_v31, %v769_v30  ;;  %v1568_v33 = vpop.f32.mrb[26].mxu1  ;;  %v1345_v30 = vld [vmem:[%s2296_s14] sm:$0xff]   ;;  %v1377_v31 = vld [vmem:[%s2296_s14 + $0x10] sm:$0xff]  }
 0x3fa   :  { %v819_v35 = vpop.f32.mrb[27].mxu1  ;;  %v840_v43 = vmul.f32 %v825_v2, %v825_v2  ;;  %v1379_v33 = vld [vmem:[%s2296_s14 + $0x20] sm:$0xff]  }
 0x3fb   :  { %v820_v37 = vadd.f32 %v819_v35, %v772_v34  ;;  %v838_v38 = vmul.f32 %v817_v32, %v817_v32  ;;  %v1380_v34 = vld [vmem:[%s2296_s14 + $0x28] sm:$0xff]   ;;  %v1381_v35 = vld [vmem:[%s2296_s14 + $0x30] sm:$0xff]  }
 0x3fd   :  { %v830_v39 = vadd.f32 %v820_v37, %v817_v32  ;;  %v839_v40 = vmul.f32 %v820_v37, %v820_v37 }
 0x3ff   :  { %v831_v44 = vadd.f32 %v830_v39, %v825_v2  ;;  %v841_v45 = vadd.f32 %v839_v40, %v838_v38 }
 0x401   :  { %v832_v46 = vrot.slane %v831_v44, 4  ;;  %v842_v48 = vadd.f32 %v841_v45, %v840_v43 }
 0x403   :  { %v833_v50 = vadd.f32 %v832_v46, %v831_v44  ;;  %v843_v51 = vrot.slane %v842_v48, 4 }
 0x405   :  { %v834_v52 = vrot.slane %v833_v50, 2  ;;  %v844_v53 = vadd.f32 %v843_v51, %v842_v48 }
 0x407   :  { %v835_v55 = vadd.f32 %v834_v52, %v833_v50  ;;  %v845_v56 = vrot.slane %v844_v53, 2 }
 0x409   :  { %v836_v57 = vrot.slane %v835_v55, 1  ;;  %v846_v58 = vadd.f32 %v845_v56, %v844_v53 }
 0x40b   :  { %v847_v59 = vrot.slane %v846_v58, 1  ;;  %v837_v61 = vadd.f32 %v836_v57, %v835_v55 }
 0x40d   :  { %v848_v41 = vadd.f32 %v847_v59, %v846_v58 }
 0x40f   :  { %v849_v62 = vsel %vm261_vm3, %v837_v61, %v848_v41 }
 0x410   :  { %1602 = vmatmul.mubr.f32.vlgmr.msra.gmra.mrb[16].mxu0 %v849_v62 }
 0x411   :  { %1610 = vmatprep.mubr.msk.f32.mxu0 %vm994_vm6, %v992_v1 }
 0x4e3   :  { %v932_v4 = vpop.f32.mrb[16].mxu0 }
 0x4e4   :  { %v936_v47 = vmul.f32 %v932_v4, %v932_v4  ;;  %v1603_v13 = vpop.f32.mrb[17].mxu0 }
 0x4e6   :  { %v938_v49 = vrot.slane %v936_v47, 7 }
 0x4e8   :  { %v940_v54 = vsub.f32 %v932_v4, %v938_v49 }
 0x4ea   :  { %v941_v60 = vmax.f32 %v940_v54, 0.0 }
 0x4ec   :  { %v943_v5 = vadd.f32 1e-05, %v941_v60 }
 0x4ee   :  { %1805 = vrsqrt.f32 %v943_v5 }
 0x4f8   :  { %v1806_v6 = vpop.eup %1805 }
 0x4f9   :  { %v952_v7 = vrot.slane %v1806_v6, %v2056_v36 }
 0x4fb   :  { %v953_v8 = vcombine.high %v952_v7, %v952_v7 }
 0x4fd   :  { %v960_v10 = vrot.slane %v953_v8, %v2056_v36 }
 0x4ff   :  { %v962_v11 = vmul.f32 %v960_v10, %v942_v9 }
 0x501   :  { %v964_v14 = vmul.f32 %v962_v11, %v932_v4  ;;  %v970_v15 = vrot.slane %v962_v11, %v2063_v42 }
 0x503   :  { %v965_v16 = vsub.f32 %v963_v12, %v964_v14  ;;  %v974_v17 = vmul.f32 %v970_v15, %v825_v2  ;;  %v972_v19 = vmul.f32 %v970_v15, %v817_v32  ;;  %v973_v20 = vmul.f32 %v970_v15, %v820_v37  ;;  %v1376_v2 = vld [vmem:[%s2296_s14 + $0x8] sm:$0xff]   ;;  %v1378_v32 = vld [vmem:[%s2296_s14 + $0x18] sm:$0xff]  }
 0x504   :  { %v1382_v37 = vld [vmem:[%s2296_s14 + $0x38] sm:$0xff]  }
 0x505   :  { %v979_v18 = vrot.slane %v965_v16, %v2063_v42  ;;  %v991_v42 = vld [vmem:[%s2291_s12 + $0x4] sm:$0x3] }
 0x506   :  { %v993_v28 = vunpack.c.l.bf16 %v991_v42 }
 0x507   :  { %v983_v21 = vadd.f32 %v979_v18, %v974_v17  ;;  %v981_v22 = vadd.f32 %v979_v18, %v972_v19  ;;  %v982_v23 = vadd.f32 %v979_v18, %v973_v20 }
 0x509   :  { %v984_v24 = vmax.f32 %v981_v22, 0.0  ;;  %v985_v25 = vmax.f32 %v982_v23, 0.0  ;;  %v986_v36 = vmax.f32 %v983_v21, 0.0 }
 0x50b   :  { %987 = vst [vmem:[%s2295_s16] sm:$0xff] %v984_v24  ;;  %988 = vst [vmem:[%s2295_s16 + $0x8] sm:$0xff] %v985_v25  ;;  %v1705_v26 = vpack.c.bf16 %v985_v25, %v984_v24 }
 0x50c   :  { %989 = vst [vmem:[%s2295_s16 + $0x10] sm:$0xff] %v986_v36 }
 0x50d   :  { %1706 = vmatprep.subr.bf16.mxu0 %v1705_v26  ;;  %1710 = vmatprep.subr.bf16.mxu1 %v1705_v26 }
 0x50e   :  { %1708 = vmatpush3.bf16.msra.mxu0 %v1705_v26  ;;  %1712 = vmatpush3.bf16.msra.mxu1 %v1705_v26 }
 0x50f   :  { %1608 = vmatprep.subr.mxu0 %v986_v36  ;;  %1617 = vmatprep.subr.mxu1 %v986_v36 }
 0x512   :  { %1609 = vmatpush3.msra.mxu0 %v986_v36  ;;  %1618 = vmatpush3.msra.mxu1 %v986_v36 }
 0x513   :  { %1611 = vmatmul.mubr.msk.f32.vlgmr.msra.gmra.mrb[18].mxu0 %vm994_vm6, %v993_v28  ;;  %1620 = vmatmul.mubr.msk.f32.vlgmr.msra.gmra.mrb[2].mxu1 %vm994_vm6, %v1079_v29 }
 0x514   :  { %1714 = vmatprep.subr.bf16.mxu1 %v1345_v30 }
 0x515   :  { %1716 = vmatpush3.bf16.msra.mxu1 %v1345_v30 }
 0x516   :  { %1718 = vmatprep.subr.bf16.mxu1 %v1376_v2 }
 0x519   :  { %1720 = vmatpush3.bf16.msra.mxu1 %v1376_v2 }
 0x51a   :  { %1722 = vmatprep.subr.bf16.mxu1 %v1377_v31 }
 0x51d   :  { %1724 = vmatpush3.bf16.msra.mxu1 %v1377_v31 }
 0x51e   :  { %1726 = vmatprep.subr.bf16.mxu1 %v1378_v32 }
 0x521   :  { %1728 = vmatpush3.bf16.msra.mxu1 %v1378_v32 }
 0x522   :  { %1730 = vmatprep.subr.bf16.mxu1 %v1379_v33 }
 0x525   :  { %1732 = vmatpush3.bf16.msra.mxu1 %v1379_v33 }
 0x526   :  { %1734 = vmatprep.subr.bf16.mxu1 %v1380_v34 }
 0x529   :  { %1736 = vmatpush3.bf16.msra.mxu1 %v1380_v34 }
 0x52a   :  { %1738 = vmatprep.subr.bf16.mxu1 %v1381_v35 }
 0x52d   :  { %1740 = vmatpush3.bf16.msra.mxu1 %v1381_v35 }
 0x52e   :  { %1742 = vmatprep.subr.bf16.mxu1 %v1382_v37 }
 0x531   :  { %1744 = vmatpush3.bf16.msra.mxu1 %v1382_v37 }
 0x5e6   :  { %v1612_v38 = vpop.f32.mrb[18].mxu0  ;;  %v1621_v39 = vpop.f32.mrb[2].mxu1 }
 0x5e7   :  { %v1162_v40 = vmax.f32 %v1612_v38, %v1621_v39  ;;  %v1067_v43 = vpop.f32.mrb[19].mxu0  ;;  %v1152_v44 = vpop.f32.mrb[3].mxu1 }
 0x5e8   :  { %v1161_v45 = vmax.f32 %v1067_v43, %v1152_v44 }
 0x5ea   :  { %v1751_v46 = vpack.i.bf16 %v1162_v40, %v1161_v45 }
 0x5ec   :  { %1752 = vrot.lane.b32.xlu0 %v1751_v46, %s1812_s24 }
 0x65e   :  { %v1753_v48 = vpop.permute.xlu0 %1752 }
 0x65f   :  { %v1755_v50 = vunpack.i.h.bf16 %v1753_v48  ;;  %v1754_v51 = vunpack.i.l.bf16 %v1753_v48 }
 0x661   :  { %v1168_v52 = vmax.f32 %v1162_v40, %v1755_v50  ;;  %v1167_v53 = vmax.f32 %v1161_v45, %v1754_v51 }
 0x663   :  { %1654 = vmatprep.mubr.f32.mxu1 %v1167_v53 }
 0x664   :  { %1655 = vmatmul.mubr.f32.vlgmr.msra.gmra.mrb[28].mxu1 %v1168_v52 }
 0x737   :  { %v1656_v55 = vpop.f32.mrb[28].mxu1 }
 0x738   :  { %1277 = vst [vmem:[%s2297_s15 + $0x8] sm:$0xf] %v1656_v55  ;;  %v1267_v56 = vpop.f32.mrb[29].mxu1 }
 0x739   :  { %1276 = vst [vmem:[%s2297_s15] sm:$0xff] %v1267_v56 }

</bundles_post_ra>
